<compile_context>
chip_gen: v5e
topology: v5e:2x2
jax: 0.10.0
libtpu: 0.0.40
codegen_flags: <defaults>
</compile_context>

<pallas_src>
import functools

import jax
import jax.numpy as jnp
from jax.experimental import pallas as pl
from jax.experimental.pallas import tpu as pltpu


def _attention_gate_kernel(g_ref, x_ref, wg_ref, wx_ref, b_ref,
                           wpsi_ref, bpsi_ref, out_ref):
    # Layout: channels on sublanes, pixels on lanes.
    #   g_ref: (Cg, T)    x_ref / out_ref: (Cx, T)
    #   wg_ref: (F_int, Cg)   wx_ref: (F_int, Cx)   b_ref: (F_int, 1) = bg + bx
    #   wpsi_ref: (1, F_int)  bpsi_ref: (1, 1)
    g = g_ref[...].astype(jnp.float32)
    x = x_ref[...].astype(jnp.float32)

    # 1x1 convs (+ folded BN) as channel contractions over the sublane axis.
    # (Two tiny-K dots; fusing them via an in-kernel channel concat is not worth
    # the layout shuffle — the MXU is at ~1-3% utilization and the op is
    # HBM-bound.)
    a = (jnp.dot(wg_ref[...], g, preferred_element_type=jnp.float32)
         + jnp.dot(wx_ref[...], x, preferred_element_type=jnp.float32)
         + b_ref[...])                                     # (F_int, T)
    a = jnp.maximum(a, 0.0)                                # ReLU

    psi = (jnp.dot(wpsi_ref[...], a, preferred_element_type=jnp.float32)
           + bpsi_ref[...])                                # (1, T) lane-dense
    psi = jax.nn.sigmoid(psi)

    out_ref[...] = (x * psi).astype(out_ref.dtype)         # sublane-broadcast gate


def fold_bn(w, b, gamma, beta, mean, var, eps=1e-5):
    """Fold eval-mode BatchNorm into a (Cin, Cout) matmul weight + bias."""
    scale = gamma / jnp.sqrt(var + eps)          # (Cout,)
    w_eff = w * scale[None, :]
    b_eff = (b - mean) * scale + beta
    return w_eff, b_eff


@functools.partial(jax.jit, static_argnames=("max_tile_px",))
def attention_block_nchw(g, x, params, *, max_tile_px=8192):
    """g: (N, F_l, H, W), x: (N, F_g, H, W) -> out: (N, F_g, H, W)."""
    N, Cx, H, W = x.shape
    _, Cg, _, _ = g.shape
    HW = H * W

    # Fold eval-mode BN into the 1x1 conv weights/biases (tiny, fused under jit).
    wg, bg = fold_bn(params["wg"], params["bg"], params["bn_g_gamma"],
                     params["bn_g_beta"], params["bn_g_mean"], params["bn_g_var"])
    wx, bx = fold_bn(params["wx"], params["bx"], params["bn_x_gamma"],
                     params["bn_x_beta"], params["bn_x_mean"], params["bn_x_var"])
    wpsi, bpsi = fold_bn(params["wpsi"], params["bpsi"], params["bn_p_gamma"],
                         params["bn_p_beta"], params["bn_p_mean"], params["bn_p_var"])

    # Transposed (output-major) weights for the channels-on-sublanes layout.
    wg_t = wg.T                              # (F_int, Cg)
    wx_t = wx.T                              # (F_int, Cx)
    b_gx = (bg + bx).reshape(-1, 1)          # (F_int, 1) — only the sum is used
    wpsi_t = wpsi.T                          # (1, F_int)
    bpsi_b = bpsi.reshape(1, 1)              # (1, 1)
    F_int = wg_t.shape[0]

    # NCHW is already (N, C, H*W) contiguous: pure reshape, no transpose pass.
    g3 = g.reshape(N, Cg, HW)
    x3 = x.reshape(N, Cx, HW)

    # Lane-dense pixel tile: multiple of 128, capped by max_tile_px.
    tile_px = min(max_tile_px, pl.cdiv(HW, 128) * 128)
    grid = (N, pl.cdiv(HW, tile_px))         # ragged last tile handled by Pallas

    def px_spec(c):
        # (None, c, tile_px): batch dim squeezed out of the kernel ref.
        return pl.BlockSpec((None, c, tile_px), lambda n, p: (n, 0, p))

    def full_spec(shape):
        return pl.BlockSpec(shape, lambda n, p: (0, 0))

    out3 = pl.pallas_call(
        _attention_gate_kernel,
        out_shape=jax.ShapeDtypeStruct((N, Cx, HW), x.dtype),
        grid_spec=pltpu.PrefetchScalarGridSpec(
            num_scalar_prefetch=0,
            grid=grid,
            in_specs=[
                px_spec(Cg),                  # g block   (Cg, T)
                px_spec(Cx),                  # x block   (Cx, T)
                full_spec((F_int, Cg)),       # Wg^T (BN folded)
                full_spec((F_int, Cx)),       # Wx^T (BN folded)
                full_spec((F_int, 1)),        # bg + bx
                full_spec((1, F_int)),        # Wpsi^T (BN folded)
                full_spec((1, 1)),            # bpsi
            ],
            out_specs=px_spec(Cx),
        ),
        compiler_params=pltpu.CompilerParams(
            dimension_semantics=("parallel", "parallel")),
    )(g3, x3, wg_t, wx_t, b_gx, wpsi_t, bpsi_b)

    return out3.reshape(N, Cx, H, W)


def make_params(key, F_g, F_l, F_int):
    ks = jax.random.split(key, 8)
    p = {
        # Conv1x1 weights stored directly in (Cin, Cout) matmul form.
        "wg": jax.random.normal(ks[0], (F_l, F_int), jnp.float32) * 0.1,
        "bg": jax.random.normal(ks[1], (F_int,), jnp.float32) * 0.1,
        "wx": jax.random.normal(ks[2], (F_g, F_int), jnp.float32) * 0.1,
        "bx": jax.random.normal(ks[3], (F_int,), jnp.float32) * 0.1,
        "wpsi": jax.random.normal(ks[4], (F_int, 1), jnp.float32) * 0.1,
        "bpsi": jax.random.normal(ks[5], (1,), jnp.float32) * 0.1,
        # BatchNorm (eval mode) parameters.
        "bn_g_gamma": jnp.ones((F_int,), jnp.float32) * 1.1,
        "bn_g_beta": jnp.ones((F_int,), jnp.float32) * 0.05,
        "bn_g_mean": jnp.zeros((F_int,), jnp.float32),
        "bn_g_var": jnp.ones((F_int,), jnp.float32),
        "bn_x_gamma": jnp.ones((F_int,), jnp.float32) * 0.9,
        "bn_x_beta": jnp.ones((F_int,), jnp.float32) * -0.05,
        "bn_x_mean": jnp.zeros((F_int,), jnp.float32),
        "bn_x_var": jnp.ones((F_int,), jnp.float32),
        "bn_p_gamma": jnp.ones((1,), jnp.float32) * 1.2,
        "bn_p_beta": jnp.ones((1,), jnp.float32) * 0.02,
        "bn_p_mean": jnp.zeros((1,), jnp.float32),
        "bn_p_var": jnp.ones((1,), jnp.float32),
    }
    return p


def reference_jax(g, x, params):
    """Pure-JAX reference of the same forward (for a sanity check)."""
    wg, bg = fold_bn(params["wg"], params["bg"], params["bn_g_gamma"],
                     params["bn_g_beta"], params["bn_g_mean"], params["bn_g_var"])
    wx, bx = fold_bn(params["wx"], params["bx"], params["bn_x_gamma"],
                     params["bn_x_beta"], params["bn_x_mean"], params["bn_x_var"])
    wpsi, bpsi = fold_bn(params["wpsi"], params["bpsi"], params["bn_p_gamma"],
                         params["bn_p_beta"], params["bn_p_mean"], params["bn_p_var"])
    g_nhwc = jnp.transpose(g, (0, 2, 3, 1))
    x_nhwc = jnp.transpose(x, (0, 2, 3, 1))
    g1 = jnp.einsum("nhwc,cf->nhwf", g_nhwc, wg) + bg
    x1 = jnp.einsum("nhwc,cf->nhwf", x_nhwc, wx) + bx
    a = jnp.maximum(g1 + x1, 0.0)
    psi = jax.nn.sigmoid(jnp.einsum("nhwf,fo->nhwo", a, wpsi) + bpsi)
    out = x_nhwc * psi
    return jnp.transpose(out, (0, 3, 1, 2))


if __name__ == "__main__":
    # Small shapes consistent with the module: F_g = F_l = 4 channels, F_int = 8.
    N, C, H, W = 2, 4, 16, 16
    F_int = 8

    key = jax.random.PRNGKey(0)
    kg, kx, kp = jax.random.split(key, 3)
    g = jax.random.normal(kg, (N, C, H, W), jnp.float32)
    x = jax.random.normal(kx, (N, C, H, W), jnp.float32)
    params = make_params(kp, F_g=C, F_l=C, F_int=F_int)

    out = attention_block_nchw(g, x, params)
    out = jax.block_until_ready(out)

    ref = jax.block_until_ready(reference_jax(g, x, params))
    assert out.shape == (N, C, H, W)
    assert jnp.max(jnp.abs(out - ref)) < 1e-4

    print("KERNEL_OK")
</pallas_src>

<mosaic_0001>
module attributes {stable_mosaic.version = 11 : i64} {
  func.func @_attention_gate_kernel(%arg0: i32, %arg1: i32, %arg2: memref<1x4x256xf32, #tpu.memory_space<vmem>>, %arg3: memref<1x4x256xf32, #tpu.memory_space<vmem>>, %arg4: memref<8x4xf32, #tpu.memory_space<vmem>>, %arg5: memref<8x4xf32, #tpu.memory_space<vmem>>, %arg6: memref<8x1xf32, #tpu.memory_space<vmem>>, %arg7: memref<1x8xf32, #tpu.memory_space<vmem>>, %arg8: memref<1x1xf32, #tpu.memory_space<vmem>>, %arg9: memref<1x4x256xf32, #tpu.memory_space<vmem>>) attributes {dimension_semantics = [#tpu.dimension_semantics<parallel>, #tpu.dimension_semantics<parallel>], iteration_bounds = array<i64: 2, 1>, scalar_prefetch = 0 : i64, scratch_operands = 0 : i64, tpu.core_type = #tpu.core_type<tc>, window_params = [{transform_indices = @transform_0, window_bounds = array<i64: 1, 4, 256>}, {transform_indices = @transform_1, window_bounds = array<i64: 1, 4, 256>}, {pipeline_mode = #tpu.pipeline_mode<synchronous>, transform_indices = @transform_2, window_bounds = array<i64: 8, 4>}, {pipeline_mode = #tpu.pipeline_mode<synchronous>, transform_indices = @transform_3, window_bounds = array<i64: 8, 4>}, {pipeline_mode = #tpu.pipeline_mode<synchronous>, transform_indices = @transform_4, window_bounds = array<i64: 8, 1>}, {pipeline_mode = #tpu.pipeline_mode<synchronous>, transform_indices = @transform_5, window_bounds = array<i64: 1, 8>}, {pipeline_mode = #tpu.pipeline_mode<synchronous>, transform_indices = @transform_6, window_bounds = array<i64: 1, 1>}, {transform_indices = @transform_7, window_bounds = array<i64: 1, 4, 256>}]} {
    %c0 = arith.constant 0 : index
    %c0_0 = arith.constant 0 : index
    %c0_1 = arith.constant 0 : index
    %0 = vector.load %arg2[%c0, %c0_0, %c0_1] : memref<1x4x256xf32, #tpu.memory_space<vmem>>, vector<1x4x256xf32>
    %1 = vector.shape_cast %0 : vector<1x4x256xf32> to vector<4x256xf32>
    %c0_2 = arith.constant 0 : index
    %c0_3 = arith.constant 0 : index
    %c0_4 = arith.constant 0 : index
    %2 = vector.load %arg3[%c0_2, %c0_3, %c0_4] : memref<1x4x256xf32, #tpu.memory_space<vmem>>, vector<1x4x256xf32>
    %3 = vector.shape_cast %2 : vector<1x4x256xf32> to vector<4x256xf32>
    %c0_5 = arith.constant 0 : index
    %c0_6 = arith.constant 0 : index
    %4 = vector.load %arg4[%c0_5, %c0_6] : memref<8x4xf32, #tpu.memory_space<vmem>>, vector<8x4xf32>
    %cst = arith.constant dense<0.000000e+00> : vector<8x256xf32>
    %5 = tpu.matmul %4, %1, %cst {dimension_numbers = #tpu.dot_dimension_numbers<[1], [0], [0], [1], [0, 0, 1, 1], [], []>} : vector<8x4xf32>, vector<4x256xf32>, vector<8x256xf32> -> vector<8x256xf32>
    %c0_7 = arith.constant 0 : index
    %c0_8 = arith.constant 0 : index
    %6 = vector.load %arg5[%c0_7, %c0_8] : memref<8x4xf32, #tpu.memory_space<vmem>>, vector<8x4xf32>
    %cst_9 = arith.constant dense<0.000000e+00> : vector<8x256xf32>
    %7 = tpu.matmul %6, %3, %cst_9 {dimension_numbers = #tpu.dot_dimension_numbers<[1], [0], [0], [1], [0, 0, 1, 1], [], []>} : vector<8x4xf32>, vector<4x256xf32>, vector<8x256xf32> -> vector<8x256xf32>
    %8 = arith.addf %5, %7 : vector<8x256xf32>
    %c0_10 = arith.constant 0 : index
    %c0_11 = arith.constant 0 : index
    %9 = vector.load %arg6[%c0_10, %c0_11] : memref<8x1xf32, #tpu.memory_space<vmem>>, vector<8x1xf32>
    %10 = vector.broadcast %9 : vector<8x1xf32> to vector<8x256xf32>
    %11 = arith.addf %8, %10 : vector<8x256xf32>
    %cst_12 = arith.constant 0.000000e+00 : f32
    %12 = vector.broadcast %cst_12 : f32 to vector<8x256xf32>
    %13 = arith.maximumf %11, %12 : vector<8x256xf32>
    %c0_13 = arith.constant 0 : index
    %c0_14 = arith.constant 0 : index
    %14 = vector.load %arg7[%c0_13, %c0_14] : memref<1x8xf32, #tpu.memory_space<vmem>>, vector<1x8xf32>
    %cst_15 = arith.constant dense<0.000000e+00> : vector<1x256xf32>
    %15 = tpu.matmul %14, %13, %cst_15 {dimension_numbers = #tpu.dot_dimension_numbers<[1], [0], [0], [1], [0, 0, 1, 1], [], []>} : vector<1x8xf32>, vector<8x256xf32>, vector<1x256xf32> -> vector<1x256xf32>
    %c0_16 = arith.constant 0 : index
    %c0_17 = arith.constant 0 : index
    %16 = vector.load %arg8[%c0_16, %c0_17] : memref<1x1xf32, #tpu.memory_space<vmem>>, vector<1x1xf32>
    %17 = vector.broadcast %16 : vector<1x1xf32> to vector<1x256xf32>
    %18 = arith.addf %15, %17 : vector<1x256xf32>
    %19 = arith.negf %18 : vector<1x256xf32>
    %20 = math.exp %19 : vector<1x256xf32>
    %cst_18 = arith.constant 1.000000e+00 : f32
    %21 = vector.broadcast %cst_18 : f32 to vector<1x256xf32>
    %22 = arith.addf %21, %20 : vector<1x256xf32>
    %23 = arith.divf %21, %22 : vector<1x256xf32>
    %24 = vector.broadcast %23 : vector<1x256xf32> to vector<4x256xf32>
    %25 = arith.mulf %3, %24 : vector<4x256xf32>
    %c0_19 = arith.constant 0 : index
    %c0_20 = arith.constant 0 : index
    %c0_21 = arith.constant 0 : index
    %26 = vector.load %arg9[%c0_19, %c0_20, %c0_21] : memref<1x4x256xf32, #tpu.memory_space<vmem>>, vector<1x4x256xf32>
    %27 = vector.shape_cast %26 : vector<1x4x256xf32> to vector<4x256xf32>
    %28 = vector.shape_cast %25 : vector<4x256xf32> to vector<1x4x256xf32>
    tpu.vector_store %arg9[%c0_19, %c0_20, %c0_21], %28 {strides = array<i32>} : memref<1x4x256xf32, #tpu.memory_space<vmem>>, vector<1x4x256xf32>,
    return
  }
  func.func @transform_0(%arg0: i32, %arg1: i32) -> (i32, i32, i32) {
    %c0_i32 = arith.constant 0 : i32
    %c0_i32_0 = arith.constant 0 : i32
    return %arg0, %c0_i32, %arg1 : i32, i32, i32
  }
  func.func @transform_1(%arg0: i32, %arg1: i32) -> (i32, i32, i32) {
    %c0_i32 = arith.constant 0 : i32
    %c0_i32_0 = arith.constant 0 : i32
    return %arg0, %c0_i32, %arg1 : i32, i32, i32
  }
  func.func @transform_2(%arg0: i32, %arg1: i32) -> (i32, i32) {
    %c0_i32 = arith.constant 0 : i32
    %c0_i32_0 = arith.constant 0 : i32
    %c0_i32_1 = arith.constant 0 : i32
    return %c0_i32, %c0_i32_0 : i32, i32
  }
  func.func @transform_3(%arg0: i32, %arg1: i32) -> (i32, i32) {
    %c0_i32 = arith.constant 0 : i32
    %c0_i32_0 = arith.constant 0 : i32
    %c0_i32_1 = arith.constant 0 : i32
    return %c0_i32, %c0_i32_0 : i32, i32
  }
  func.func @transform_4(%arg0: i32, %arg1: i32) -> (i32, i32) {
    %c0_i32 = arith.constant 0 : i32
    %c0_i32_0 = arith.constant 0 : i32
    %c0_i32_1 = arith.constant 0 : i32
    return %c0_i32, %c0_i32_0 : i32, i32
  }
  func.func @transform_5(%arg0: i32, %arg1: i32) -> (i32, i32) {
    %c0_i32 = arith.constant 0 : i32
    %c0_i32_0 = arith.constant 0 : i32
    %c0_i32_1 = arith.constant 0 : i32
    return %c0_i32, %c0_i32_0 : i32, i32
  }
  func.func @transform_6(%arg0: i32, %arg1: i32) -> (i32, i32) {
    %c0_i32 = arith.constant 0 : i32
    %c0_i32_0 = arith.constant 0 : i32
    %c0_i32_1 = arith.constant 0 : i32
    return %c0_i32, %c0_i32_0 : i32, i32
  }
  func.func @transform_7(%arg0: i32, %arg1: i32) -> (i32, i32, i32) {
    %c0_i32 = arith.constant 0 : i32
    %c0_i32_0 = arith.constant 0 : i32
    return %arg0, %c0_i32, %arg1 : i32, i32, i32
  }
}

</mosaic_0001>

<bundles_post_ra>
// kernel: attention_block_nchw.1
= control target key start
LH: loop header
LB: loop body
LE: loop exit
PB: predicated region body
PF: predicated region fallthrough
CT: control target
= control target key end

     0   :  { %s808_s26 = smov 0   ;;  %s810_s27 = smov 0   ;;  %s870_s0 = inlined_call_operand.vmem [shape: f32[2,4,256], index: 0, kind: input, shape index: {}]   ;;  %s871_s1 = inlined_call_operand.vmem [shape: f32[2,4,256], index: 1, kind: input, shape index: {}]   ;;  %s872_s2 = inlined_call_operand.vmem [shape: f32[8,4], index: 2, kind: input, shape index: {}]   ;;  %s873_s3 = inlined_call_operand.vmem [shape: f32[8,4], index: 3, kind: input, shape index: {}]   ;;  %s874_s4 = inlined_call_operand.vmem [shape: f32[8,1], index: 4, kind: input, shape index: {}]   ;;  %s875_s5 = inlined_call_operand.vmem [shape: f32[1,8], index: 5, kind: input, shape index: {}]   ;;  %s876_s6 = inlined_call_operand.<no memory space> [shape: f32[1,1], index: 6, kind: input, shape index: {}]   ;;  %s877_s7 = inlined_call_operand.vmem [shape: f32[2,4,256], index: 7, kind: output, shape index: {}]  }
   0x1   :  { %v12_v0 = vstv %s876_s6  ;;  %s812_s28 = smov 0  }
   0x2   :  { %13 = vst [vmem:[#allocation2] sm:$0x1] %v12_v0 }
   0x3 LB: > { %s31_s6 = sadd.s32 1, %s758_s27  ;;  %p682_p0 = scmp.ge.s32.totalorder %s762_s28, 1  ;;  %s762_s28 = sphi %s812_s28, %s19_s28   ;;  %s758_s27 = sphi %s810_s27, %s879_s27   ;;  %s754_s26 = sphi %s808_s26, %s878_s26  }
   0x4   : > { %p33_p1 = scmp.ge.s32.totalorder %s31_s6, 2  ;;  %p277_p2 = scmp.lt.s32.totalorder %s762_s28, 3 }
   0x6   : > { %s881_s6 = smov (%p33_p1, %s31_s6), 0  ;;  %p278_p3 = pnand %p682_p0, %p277_p2 }
   0x7   : > { %p327_p4 = scmp.lt.s32.totalorder (!%p278_p3), %s754_s26, 1 }
   0x8   : > { %281 = sbr.rel (%p278_p3) target bundleno = 338 (0x152), region = 48 }
   0xd   : > { %v764_v1 = vmov 0   ;;  %v464_v2 = vld [vmem:[%s874_s4] sm:$0xff]  ;;  %s883_s26 = smov (!%p327_p4, %s754_s26), 1  ;;  %v475_v4 = vld [vmem:[#allocation2] sm:$0x1]  ;;  %vm368_vm0 = vcmask 1043456  }
   0xe   : > { %731 = vset.pattern.permute.xlu0 %v764_v1  ;;  %s829_s8 = sshll.u32 %s883_s26, 3  ;;  %v359_v6 = vld [vmem:[%s873_s3] sm:$0xff]  ;;  %vm364_vm1 = vcmask 31744   ;;  %vm482_vm2 = vcmask 64512  }
   0xf   : > { %467 = vperm.xlu0 %731, %v464_v2   ;;  %s344_s11 = scalar_lea.vmem %s871_s1, %s829_s8  ;;  %s334_s14 = scalar_lea.vmem %s870_s0, %s829_s8  ;;  %v358_v9 = vld [vmem:[%s872_s2] sm:$0xff] }
  0x10   : > { %v835_v3 = vld [vmem:[%s344_s11] sm:$0xff]  ;;  %s354_s23 = scalar_lea.vmem %s877_s7, %s829_s8 }
  0x11   : > { %361 = vst [vmem:[#allocation1] ss:$2 sm:$0xff] %v835_v3  ;;  %v356_v5 = vld [vmem:[%s334_s14] sm:$0xff] }
  0x12   : > { %v474_v23 = vld [vmem:[%s875_s5] sm:$0x1] }
  0x17   : > { %478 = vperm.xlu0 %731, %v475_v4  }
  0x18   : > { %v362_v7 = vld.sshfl [vmem:[#allocation1] sm:$0xff pattern:$0x75316420]  ;;  %v363_v8 = vld.sshfl [vmem:[#allocation1 + $0x8] sm:$0xff pattern:$0x75316420] }
  0x19   : > { %414 = vst [vmem:[#allocation1] ss:$2 sm:$0xff] %v356_v5  ;;  %689 = vmatpush.msk.msra.mxu0 %vm368_vm0, %v362_v7  ;;  %691 = vmatpush.msk.msra.mxu1 %vm368_vm0, %v363_v8 }
  0x1a   : > { %690 = vmatmul.msk.f32.vlgmr.msra.gmra.mxu0 %vm364_vm1, %v359_v6  ;;  %692 = vmatmul.msk.f32.vlgmr.msra.gmra.mxu1 %vm364_vm1, %v359_v6 }
  0x20   : > { %v415_v10 = vld.sshfl [vmem:[#allocation1] sm:$0xff pattern:$0x75316420]  ;;  %v416_v11 = vld.sshfl [vmem:[#allocation1 + $0x8] sm:$0xff pattern:$0x75316420] }
  0x21   : > { %693 = vmatpush.msk.msra.mxu2 %vm368_vm0, %v415_v10  ;;  %695 = vmatpush.msk.msra.mxu3 %vm368_vm0, %v416_v11 }
  0x22   : > { %694 = vmatmul.msk.f32.vlgmr.msra.gmra.mxu2 %vm364_vm1, %v358_v9  ;;  %696 = vmatmul.msk.f32.vlgmr.msra.gmra.mxu3 %vm364_vm1, %v358_v9 }
  0x81   : > { %v468_v18 = vpop.permute.xlu0 %467 }
  0x89   : > { %v479_v24 = vpop.permute.xlu0 %478 }
  0x8a   : > { %v481_v25 = vperm.slane %v479_v24, 0 }
  0x97   : > { %v390_v12 = vpop.f32.mrf.mxu0  ;;  %v410_v13 = vpop.f32.mrf.mxu1 }
  0xa5   : > { %v441_v14 = vpop.f32.mrf.mxu2  ;;  %v461_v15 = vpop.f32.mrf.mxu3 }
  0xa6   : > { %v442_v16 = vadd.f32 %v441_v14, %v390_v12  ;;  %v462_v17 = vadd.f32 %v461_v15, %v410_v13 }
  0xa8   : > { %v470_v19 = vadd.f32 %v468_v18, %v442_v16  ;;  %v471_v20 = vadd.f32 %v468_v18, %v462_v17 }
  0xaa   : > { %v472_v21 = vmax.f32 %v470_v19, 0.0  ;;  %v473_v22 = vmax.f32 %v471_v20, 0.0 }
  0xac   : > { %501 = vmatpush.msrb.mxu0 %v472_v21  ;;  %521 = vmatpush.msrb.mxu1 %v473_v22 }
  0xad   : > { %697 = vmatmul.msk.f32.vlgmr.msrb.gmra.mxu0 %vm482_vm2, %v474_v23  ;;  %698 = vmatmul.msk.f32.vlgmr.msrb.gmra.mxu1 %vm482_vm2, %v474_v23 }
 0x12a   : > { %v503_v26 = vpop.f32.mrf.mxu0  ;;  %v523_v27 = vpop.f32.mrf.mxu1 }
 0x12b   : > { %v504_v28 = vadd.f32 %v503_v26, %v481_v25  ;;  %v524_v29 = vadd.f32 %v523_v27, %v481_v25 }
 0x12d   : > { %v699_v30 = vmul.f32 -1.442695, %v504_v28  ;;  %v700_v31 = vmul.f32 -1.442695, %v524_v29 }
 0x12f   : > { %732 = vpow2.f32 %v699_v30 }
 0x130   : > { %734 = vpow2.f32 %v700_v31 }
 0x135   : > { %v733_v32 = vpop.eup %732 }
 0x136   : > { %v735_v33 = vpop.eup %734  ;;  %v532_v34 = vadd.f32 1.0, %v733_v32 }
 0x137   : > { %v533_v35 = vadd.f32 1.0, %v735_v33 }
 0x138   : > { %736 = vrcp.f32 %v532_v34  ;;  %v545_v43 = vand.u32 2147483648, %v532_v34  ;;  %v543_v45 = vand.u32 2147483647, %v532_v34  ;;  %vm539_vm5 = vweird.f32 %v532_v34 }
 0x139   : > { %738 = vrcp.f32 %v533_v35  ;;  %v560_v44 = vand.u32 2147483648, %v533_v35  ;;  %v558_v47 = vand.u32 2147483647, %v533_v35  ;;  %vm554_vm7 = vweird.f32 %v533_v35 }
 0x13a   : > { %v546_v51 = vor.u32 1.1754944e-38, %v545_v43  ;;  %vm544_vm9 = vcmp.eq.f32.partialorder %v543_v45, 8.507059e+37 }
 0x13b   : > { %v561_v52 = vor.u32 1.1754944e-38, %v560_v44  ;;  %vm559_vm10 = vcmp.eq.f32.partialorder %v558_v47, 8.507059e+37 }
 0x13e   : > { %v737_v36 = vpop.eup %736 }
 0x13f   : > { %v739_v37 = vpop.eup %738  ;;  %v535_v38 = vmul.f32 %v737_v36, %v532_v34  ;;  %vm540_vm3 = vweird.f32 %v737_v36 }
 0x140   : > { %v550_v39 = vmul.f32 %v739_v37, %v533_v35  ;;  %vm555_vm4 = vweird.f32 %v739_v37  ;;  %vm541_vm6 = vmor %vm539_vm5, %vm540_vm3 }
 0x141   : > { %v536_v40 = vsub.f32 1.0, %v535_v38  ;;  %vm556_vm8 = vmor %vm554_vm7, %vm555_vm4 }
 0x142   : > { %v551_v41 = vsub.f32 1.0, %v550_v39 }
 0x143   : > { %v537_v42 = vmul.f32 %v737_v36, %v536_v40 }
 0x144   : > { %v552_v46 = vmul.f32 %v739_v37, %v551_v41 }
 0x145   : > { %v538_v48 = vadd.f32 %v737_v36, %v537_v42 }
 0x146   : > { %v553_v49 = vadd.f32 %v739_v37, %v552_v46 }
 0x147   : > { %v542_v50 = vsel %vm541_vm6, %v737_v36, %v538_v48 }
 0x148   : > { %v557_v53 = vsel %vm556_vm8, %v739_v37, %v553_v49  ;;  %v547_v54 = vsel %vm544_vm9, %v546_v51, %v542_v50 }
 0x149   : > { %v562_v55 = vsel %vm559_vm10, %v561_v52, %v557_v53  ;;  %v564_v57 = vperm.slane %v547_v54, 0 }
 0x14a   : > { %v565_v56 = vperm.slane %v562_v55, 0 }
 0x14c   : > { %v568_v58 = vrot.slane %v565_v56, 4 }
 0x14e   : > { %v569_v59 = vsel %vm368_vm0, %v564_v57, %v568_v58 }
 0x14f   : > { %v571_v60 = vmul.f32 %v569_v59, %v835_v3 }
 0x151   : > { %572 = vst [vmem:[%s354_s23] sm:$0xff] %v571_v60 }
 0x152 PF: > { %s19_s28 = sadd.s32 1, %s762_s28   ;;  %s878_s26 = smov %s758_s27 }
 0x153   : > { %p16_p5 = scmp.ge.s32.totalorder %s19_s28, 4   ;;  %s879_s27 = smov %s881_s6 }
 0x155   :  { %18 = sbr.rel (!%p16_p5) target bundleno = 3 (0x3), region = 81 }

</bundles_post_ra>
